<compile_context>
chip_gen: v6e
topology: v6e:2x2x1
jax: 0.10.0
libtpu: 0.0.40
codegen_flags: <defaults>
</compile_context>

<pallas_src>
import functools

import jax
import jax.numpy as jnp
from jax.experimental import pallas as pl
from jax.experimental.pallas import tpu as pltpu

LN_EPS = 1e-5  # nn.LayerNorm default


def _round_up(n, m):
    return (n + m - 1) // m * m


def _pad_to(a, rows, cols, dtype):
    """Zero-pad a 2-D array to (rows, cols) and cast; no-op copies are skipped."""
    a = a.astype(dtype)
    r, c = a.shape
    if (r, c) == (rows, cols):
        return a
    return jnp.zeros((rows, cols), dtype).at[:r, :c].set(a)


def supervised_head_kernel(x_ref, w1_ref, b1_ref, gamma_ref, beta_ref,
                           w2_ref, b2_ref, o_ref, *, d_in, mxu_dtype):
    # linear1 on the MXU (bf16 inputs on v6e/v7x, f32 accumulation).
    h = jnp.dot(x_ref[...].astype(mxu_dtype), w1_ref[...].astype(mxu_dtype),
                preferred_element_type=jnp.float32)
    h = h + b1_ref[...]                      # (1, d_in_p) broadcasts; padded lanes stay 0

    # LayerNorm over the *true* d_in features. Padded lanes of h are exactly 0 (zero-filled
    # w1 columns / b1 entries), so plain sums along the lane axis are exact; divide by d_in.
    # Single-pass statistics kept in f32: var = E[h^2] - mean^2 (clamped >= 0).
    inv_n = jnp.float32(1.0 / d_in)
    s1 = jnp.sum(h, axis=-1, keepdims=True)
    s2 = jnp.sum(h * h, axis=-1, keepdims=True)
    mean = s1 * inv_n
    var = jnp.maximum(s2 * inv_n - mean * mean, 0.0)
    inv_std = jax.lax.rsqrt(var + LN_EPS)    # EUP, off the VALU critical path
    # gamma/beta are zero on padded lanes -> hn padded lanes are exactly 0.
    hn = (h - mean) * (inv_std * gamma_ref[...]) + beta_ref[...]

    # ReLU (padded lanes remain 0).
    hr = jnp.maximum(hn, 0.0)

    # linear2 on the MXU; padded rows of w2 are zero, padded output lanes stay 0.
    y = jnp.dot(hr.astype(mxu_dtype), w2_ref[...].astype(mxu_dtype),
                preferred_element_type=jnp.float32)
    o_ref[...] = (y + b2_ref[...]).astype(o_ref.dtype)


def supervised_head(x, w1, b1, gamma, beta, w2, b2, *,
                    block_b=512, mxu_dtype=jnp.bfloat16):
    """x: [B, d_in]; w1: [d_in, d_in]; w2: [d_in, d_out]; biases/affine broadcastable to [1, d].

    Pads features to multiples of 128 (lane-dense tiles, unmasked stores) and the batch to a
    multiple of the batch tile, then slices the result back to [B, d_out].
    """
    B, d_in = x.shape
    d_out = w2.shape[1]
    out_dtype = x.dtype
    f32 = jnp.float32

    d_in_p = _round_up(d_in, 128)
    d_out_p = _round_up(d_out, 128)
    tile_b = min(block_b, _round_up(B, 8))     # multiple of 8 (f32 sublanes), <= block_b
    b_pad = _round_up(B, tile_b)

    # Zero-fill all padding: padded lanes of h, hn, hr and y stay exactly 0, so LayerNorm
    # statistics and the final matmul are unaffected by padding.
    xp = _pad_to(x, b_pad, d_in_p, mxu_dtype)
    w1p = _pad_to(w1, d_in_p, d_in_p, mxu_dtype)
    w2p = _pad_to(w2, d_in_p, d_out_p, mxu_dtype)
    b1p = _pad_to(b1.reshape(1, d_in), 1, d_in_p, f32)
    gp = _pad_to(gamma.reshape(1, d_in), 1, d_in_p, f32)
    bp = _pad_to(beta.reshape(1, d_in), 1, d_in_p, f32)
    b2p = _pad_to(b2.reshape(1, d_out), 1, d_out_p, f32)

    grid = (b_pad // tile_b,)
    kernel = functools.partial(supervised_head_kernel, d_in=d_in, mxu_dtype=mxu_dtype)

    # Advisory cost estimate for XLA's scheduler.
    flops = 2 * b_pad * d_in_p * d_in_p + 2 * b_pad * d_in_p * d_out_p
    isz = jnp.dtype(mxu_dtype).itemsize
    bytes_accessed = (xp.size * isz + w1p.size * isz + w2p.size * isz
                      + (b1p.size + gp.size + bp.size + b2p.size) * 4
                      + b_pad * d_out_p * jnp.dtype(out_dtype).itemsize)
    cost = pl.CostEstimate(flops=flops, transcendentals=b_pad,
                           bytes_accessed=bytes_accessed)

    # VMEM budget (v7x: 64 MiB physical / 32 MiB default scoped limit):
    # resident weights + double-buffered x/out tiles + f32 intermediates, 2x slack, capped.
    resident = (w1p.size + w2p.size) * isz + (b1p.size + gp.size + bp.size + b2p.size) * 4
    per_step = 2 * (tile_b * d_in_p * isz
                    + tile_b * d_out_p * jnp.dtype(out_dtype).itemsize)
    scratch = 4 * tile_b * d_in_p * 4
    vmem_limit = int(min(max(32 * 2 ** 20, 2 * (resident + per_step + scratch)),
                         64 * 2 ** 20))

    out = pl.pallas_call(
        kernel,
        out_shape=jax.ShapeDtypeStruct((b_pad, d_out_p), out_dtype),
        grid=grid,
        in_specs=[
            pl.BlockSpec((tile_b, d_in_p), lambda i: (i, 0)),    # x tile (pipelined)
            pl.BlockSpec((d_in_p, d_in_p), lambda i: (0, 0)),    # w1 (resident)
            pl.BlockSpec((1, d_in_p), lambda i: (0, 0)),         # b1
            pl.BlockSpec((1, d_in_p), lambda i: (0, 0)),         # gamma
            pl.BlockSpec((1, d_in_p), lambda i: (0, 0)),         # beta
            pl.BlockSpec((d_in_p, d_out_p), lambda i: (0, 0)),   # w2 (resident)
            pl.BlockSpec((1, d_out_p), lambda i: (0, 0)),        # b2
        ],
        out_specs=pl.BlockSpec((tile_b, d_out_p), lambda i: (i, 0)),
        compiler_params=pltpu.CompilerParams(
            dimension_semantics=("parallel",),
            vmem_limit_bytes=vmem_limit),
        cost_estimate=cost,
    )(xp, w1p, b1p, gp, bp, w2p, b2p)

    return out[:B, :d_out]


def init_params(key, d_in, d_out):
    """Deterministic synthetic parameters with PyTorch-Linear-like init.

    nn.Linear(d_in, d_in) holds W of shape (d_in, d_in); nn.Linear(d_in, d_out)
    holds W of shape (d_out, d_in). We store them pre-transposed for x @ W.
    """
    k1, k2, k3, k4 = jax.random.split(key, 4)
    scale1 = 1.0 / jnp.sqrt(jnp.float32(d_in))
    w1 = jax.random.uniform(k1, (d_in, d_in), jnp.float32, -scale1, scale1)
    b1 = jax.random.uniform(k2, (1, d_in), jnp.float32, -scale1, scale1)
    gamma = jnp.ones((1, d_in), jnp.float32)   # LayerNorm weight init
    beta = jnp.zeros((1, d_in), jnp.float32)   # LayerNorm bias init
    w2 = jax.random.uniform(k3, (d_in, d_out), jnp.float32, -scale1, scale1)
    b2 = jax.random.uniform(k4, (1, d_out), jnp.float32, -scale1, scale1)
    return w1, b1, gamma, beta, w2, b2


def reference(x, w1, b1, gamma, beta, w2, b2):
    h = x @ w1 + b1
    mean = h.mean(-1, keepdims=True)
    var = ((h - mean) ** 2).mean(-1, keepdims=True)
    hn = (h - mean) / jnp.sqrt(var + LN_EPS) * gamma + beta
    hr = jnp.maximum(hn, 0.0)
    return hr @ w2 + b2


if __name__ == "__main__":
    B, d_in, d_out = 8, 32, 4
    key = jax.random.PRNGKey(0)
    kx, kp = jax.random.split(key)
    x = jax.random.normal(kx, (B, d_in), jnp.float32)
    params = init_params(kp, d_in, d_out)

    ref = reference(x, *params)

    # Exact path (f32 MXU inputs): tight tolerance check.
    out_f32 = jax.block_until_ready(supervised_head(x, *params, mxu_dtype=jnp.float32))
    assert out_f32.shape == (B, d_out)
    assert jnp.allclose(out_f32, ref, atol=1e-4, rtol=1e-4)

    # Fast path (bf16 MXU inputs, f32 accumulation + f32 LayerNorm statistics).
    out_bf16 = jax.block_until_ready(supervised_head(x, *params, mxu_dtype=jnp.bfloat16))
    assert out_bf16.shape == (B, d_out)
    assert jnp.allclose(out_bf16, ref, atol=5e-2, rtol=5e-2)

    print("KERNEL_OK")
</pallas_src>

<mosaic_0001>
module attributes {stable_mosaic.version = 11 : i64} {
  func.func @supervised_head_kernel(%arg0: i32, %arg1: memref<8x128xf32, #tpu.memory_space<vmem>>, %arg2: memref<128x128xf32, #tpu.memory_space<vmem>>, %arg3: memref<1x128xf32, #tpu.memory_space<vmem>>, %arg4: memref<1x128xf32, #tpu.memory_space<vmem>>, %arg5: memref<1x128xf32, #tpu.memory_space<vmem>>, %arg6: memref<128x128xf32, #tpu.memory_space<vmem>>, %arg7: memref<1x128xf32, #tpu.memory_space<vmem>>, %arg8: memref<8x128xf32, #tpu.memory_space<vmem>>) attributes {dimension_semantics = [#tpu.dimension_semantics<parallel>], iteration_bounds = array<i64: 1>, scalar_prefetch = 0 : i64, scratch_operands = 0 : i64, tpu.core_type = #tpu.core_type<tc>, window_params = [{transform_indices = @transform_0, window_bounds = array<i64: 8, 128>}, {pipeline_mode = #tpu.pipeline_mode<synchronous>, transform_indices = @transform_1, window_bounds = array<i64: 128, 128>}, {pipeline_mode = #tpu.pipeline_mode<synchronous>, transform_indices = @transform_2, window_bounds = array<i64: 1, 128>}, {pipeline_mode = #tpu.pipeline_mode<synchronous>, transform_indices = @transform_3, window_bounds = array<i64: 1, 128>}, {pipeline_mode = #tpu.pipeline_mode<synchronous>, transform_indices = @transform_4, window_bounds = array<i64: 1, 128>}, {pipeline_mode = #tpu.pipeline_mode<synchronous>, transform_indices = @transform_5, window_bounds = array<i64: 128, 128>}, {pipeline_mode = #tpu.pipeline_mode<synchronous>, transform_indices = @transform_6, window_bounds = array<i64: 1, 128>}, {transform_indices = @transform_7, window_bounds = array<i64: 8, 128>}]} {
    %c0 = arith.constant 0 : index
    %c0_0 = arith.constant 0 : index
    %0 = vector.load %arg1[%c0, %c0_0] : memref<8x128xf32, #tpu.memory_space<vmem>>, vector<8x128xf32>
    %c0_1 = arith.constant 0 : index
    %c0_2 = arith.constant 0 : index
    %1 = vector.load %arg2[%c0_1, %c0_2] : memref<128x128xf32, #tpu.memory_space<vmem>>, vector<128x128xf32>
    %cst = arith.constant dense<0.000000e+00> : vector<8x128xf32>
    %2 = tpu.matmul %0, %1, %cst {dimension_numbers = #tpu.dot_dimension_numbers<[1], [0], [0], [1], [0, 0, 1, 1], [], []>} : vector<8x128xf32>, vector<128x128xf32>, vector<8x128xf32> -> vector<8x128xf32>
    %c0_3 = arith.constant 0 : index
    %c0_4 = arith.constant 0 : index
    %3 = vector.load %arg3[%c0_3, %c0_4] : memref<1x128xf32, #tpu.memory_space<vmem>>, vector<1x128xf32>
    %4 = vector.broadcast %3 : vector<1x128xf32> to vector<8x128xf32>
    %5 = arith.addf %2, %4 : vector<8x128xf32>
    %cst_5 = arith.constant dense<0.000000e+00> : vector<8xf32>
    %6 = vector.multi_reduction <add>, %5, %cst_5 [1] : vector<8x128xf32> to vector<8xf32>
    %7 = vector.shape_cast %6 : vector<8xf32> to vector<8x1xf32>
    %8 = arith.mulf %5, %5 : vector<8x128xf32>
    %cst_6 = arith.constant dense<0.000000e+00> : vector<8xf32>
    %9 = vector.multi_reduction <add>, %8, %cst_6 [1] : vector<8x128xf32> to vector<8xf32>
    %10 = vector.shape_cast %9 : vector<8xf32> to vector<8x1xf32>
    %cst_7 = arith.constant 3.125000e-02 : f32
    %11 = vector.broadcast %cst_7 : f32 to vector<8x1xf32>
    %12 = arith.mulf %7, %11 : vector<8x1xf32>
    %cst_8 = arith.constant 3.125000e-02 : f32
    %13 = vector.broadcast %cst_8 : f32 to vector<8x1xf32>
    %14 = arith.mulf %10, %13 : vector<8x1xf32>
    %15 = arith.mulf %12, %12 : vector<8x1xf32>
    %16 = arith.subf %14, %15 : vector<8x1xf32>
    %cst_9 = arith.constant 0.000000e+00 : f32
    %17 = vector.broadcast %cst_9 : f32 to vector<8x1xf32>
    %18 = arith.maximumf %16, %17 : vector<8x1xf32>
    %cst_10 = arith.constant 9.99999974E-6 : f32
    %19 = vector.broadcast %cst_10 : f32 to vector<8x1xf32>
    %20 = arith.addf %18, %19 : vector<8x1xf32>
    %21 = math.rsqrt %20 : vector<8x1xf32>
    %22 = vector.broadcast %12 : vector<8x1xf32> to vector<8x128xf32>
    %23 = arith.subf %5, %22 : vector<8x128xf32>
    %c0_11 = arith.constant 0 : index
    %c0_12 = arith.constant 0 : index
    %24 = vector.load %arg4[%c0_11, %c0_12] : memref<1x128xf32, #tpu.memory_space<vmem>>, vector<1x128xf32>
    %25 = vector.broadcast %21 : vector<8x1xf32> to vector<8x128xf32>
    %26 = vector.broadcast %24 : vector<1x128xf32> to vector<8x128xf32>
    %27 = arith.mulf %25, %26 : vector<8x128xf32>
    %28 = arith.mulf %23, %27 : vector<8x128xf32>
    %c0_13 = arith.constant 0 : index
    %c0_14 = arith.constant 0 : index
    %29 = vector.load %arg5[%c0_13, %c0_14] : memref<1x128xf32, #tpu.memory_space<vmem>>, vector<1x128xf32>
    %30 = vector.broadcast %29 : vector<1x128xf32> to vector<8x128xf32>
    %31 = arith.addf %28, %30 : vector<8x128xf32>
    %cst_15 = arith.constant 0.000000e+00 : f32
    %32 = vector.broadcast %cst_15 : f32 to vector<8x128xf32>
    %33 = arith.maximumf %31, %32 : vector<8x128xf32>
    %c0_16 = arith.constant 0 : index
    %c0_17 = arith.constant 0 : index
    %34 = vector.load %arg6[%c0_16, %c0_17] : memref<128x128xf32, #tpu.memory_space<vmem>>, vector<128x128xf32>
    %cst_18 = arith.constant dense<0.000000e+00> : vector<8x128xf32>
    %35 = tpu.matmul %33, %34, %cst_18 {dimension_numbers = #tpu.dot_dimension_numbers<[1], [0], [0], [1], [0, 0, 1, 1], [], []>} : vector<8x128xf32>, vector<128x128xf32>, vector<8x128xf32> -> vector<8x128xf32>
    %c0_19 = arith.constant 0 : index
    %c0_20 = arith.constant 0 : index
    %36 = vector.load %arg7[%c0_19, %c0_20] : memref<1x128xf32, #tpu.memory_space<vmem>>, vector<1x128xf32>
    %37 = vector.broadcast %36 : vector<1x128xf32> to vector<8x128xf32>
    %38 = arith.addf %35, %37 : vector<8x128xf32>
    %c0_21 = arith.constant 0 : index
    %c0_22 = arith.constant 0 : index
    %39 = vector.load %arg8[%c0_21, %c0_22] : memref<8x128xf32, #tpu.memory_space<vmem>>, vector<8x128xf32>
    tpu.vector_store %arg8[%c0_21, %c0_22], %38 {strides = array<i32>} : memref<8x128xf32, #tpu.memory_space<vmem>>, vector<8x128xf32>,
    return
  }
  func.func @transform_0(%arg0: i32) -> (i32, i32) {
    %c0_i32 = arith.constant 0 : i32
    %c0_i32_0 = arith.constant 0 : i32
    return %arg0, %c0_i32 : i32, i32
  }
  func.func @transform_1(%arg0: i32) -> (i32, i32) {
    %c0_i32 = arith.constant 0 : i32
    %c0_i32_0 = arith.constant 0 : i32
    %c0_i32_1 = arith.constant 0 : i32
    return %c0_i32, %c0_i32_0 : i32, i32
  }
  func.func @transform_2(%arg0: i32) -> (i32, i32) {
    %c0_i32 = arith.constant 0 : i32
    %c0_i32_0 = arith.constant 0 : i32
    %c0_i32_1 = arith.constant 0 : i32
    return %c0_i32, %c0_i32_0 : i32, i32
  }
  func.func @transform_3(%arg0: i32) -> (i32, i32) {
    %c0_i32 = arith.constant 0 : i32
    %c0_i32_0 = arith.constant 0 : i32
    %c0_i32_1 = arith.constant 0 : i32
    return %c0_i32, %c0_i32_0 : i32, i32
  }
  func.func @transform_4(%arg0: i32) -> (i32, i32) {
    %c0_i32 = arith.constant 0 : i32
    %c0_i32_0 = arith.constant 0 : i32
    %c0_i32_1 = arith.constant 0 : i32
    return %c0_i32, %c0_i32_0 : i32, i32
  }
  func.func @transform_5(%arg0: i32) -> (i32, i32) {
    %c0_i32 = arith.constant 0 : i32
    %c0_i32_0 = arith.constant 0 : i32
    %c0_i32_1 = arith.constant 0 : i32
    return %c0_i32, %c0_i32_0 : i32, i32
  }
  func.func @transform_6(%arg0: i32) -> (i32, i32) {
    %c0_i32 = arith.constant 0 : i32
    %c0_i32_0 = arith.constant 0 : i32
    %c0_i32_1 = arith.constant 0 : i32
    return %c0_i32, %c0_i32_0 : i32, i32
  }
  func.func @transform_7(%arg0: i32) -> (i32, i32) {
    %c0_i32 = arith.constant 0 : i32
    %c0_i32_0 = arith.constant 0 : i32
    return %arg0, %c0_i32 : i32, i32
  }
}

</mosaic_0001>

<bundles_post_ra>
// kernel: tpu_custom_call.1
= control target key start
LH: loop header
LB: loop body
LE: loop exit
PB: predicated region body
PF: predicated region fallthrough
CT: control target
= control target key end

     0   :  { %12 = vsyncpa [#allocation3], 0  ;;  %s617_s0 = inlined_call_operand.hbm [shape: f32[8,128], index: 0, kind: input, shape index: {}]   ;;  %s618_s1 = inlined_call_operand.hbm [shape: f32[128,128], index: 1, kind: input, shape index: {}]   ;;  %s619_s2 = inlined_call_operand.vmem [shape: f32[1,128], index: 2, kind: input, shape index: {}]   ;;  %s620_s3 = inlined_call_operand.vmem [shape: f32[1,128], index: 3, kind: input, shape index: {}]   ;;  %s621_s4 = inlined_call_operand.vmem [shape: f32[1,128], index: 4, kind: input, shape index: {}]   ;;  %s622_s5 = inlined_call_operand.hbm [shape: f32[128,128], index: 5, kind: input, shape index: {}]   ;;  %s623_s6 = inlined_call_operand.vmem [shape: f32[1,128], index: 6, kind: input, shape index: {}]   ;;  %s624_s7 = inlined_call_operand.hbm [shape: f32[8,128], index: 7, kind: output, shape index: {}]  }
   0x1   :  { %13 = vsyncpa [#allocation6], 0 }
   0x2   :  { %14 = vsyncpa [#allocation4], 0  ;;  %s505_s24 = smov [#allocation5]  }
   0x3   :  { %s30_s25 = sshll.u32 %s505_s24, 4  ;;  %s31_s25 = int_to_ptr.vmem [resolvable:$true] %s30_s25 }
   0x4   :  { %s427_s26 = scalar_lea.vmem %s31_s25, 2048  ;;  %p432_p1 = scmp.lt.s32.totalorder %s31_s25, %s31_s25 }
   0x5   :  { %p428_p0 = scmp.ne.s32.totalorder %s31_s25, %s427_s26  ;;  %p433_p2 = scmp.lt.s32.totalorder %s427_s26, %s427_s26 }
   0x7   :  { %p434_p3 = por %p433_p2, %p432_p1 }
   0x9   :  { %p435_p4 = pnand %p434_p3, %p428_p0 }
   0xb   :  { %438 = shalt.err (!%p435_p4)
}
   0xc   :  { %s506_s27 = smov 128   ;;  %s507_s28 = smov 8  }
   0xd   :  { %36 = dma.hbm_to_vmem [thread:$0]  %s618_s1, 2048, %s31_s25, [#allocation6], %s506_s27, %s506_s27, %s507_s28  }
   0xe   :  { %s508_s8 = smov [#allocation2]   ;;  %s509_s10 = smov [#allocation7]  }
   0xf   :  { %s21_s9 = sshll.u32 %s508_s8, 4  ;;  %s48_s11 = sshll.u32 %s509_s10, 4  ;;  %s22_s9 = int_to_ptr.vmem [resolvable:$true] %s21_s9  ;;  %s49_s11 = int_to_ptr.vmem [resolvable:$true] %s48_s11 }
  0x10   :  { %s447_s12 = scalar_lea.vmem %s22_s9, 128  ;;  %p452_p6 = scmp.lt.s32.totalorder %s22_s9, %s22_s9 }
  0x11   :  { %p448_p5 = scmp.ne.s32.totalorder %s22_s9, %s447_s12  ;;  %p453_p7 = scmp.lt.s32.totalorder %s447_s12, %s447_s12 }
  0x13   :  { %p454_p8 = por %p453_p7, %p452_p6 }
  0x15   :  { %p455_p9 = pnand %p454_p8, %p448_p5 }
  0x17   :  { %458 = shalt.err (!%p455_p9)
}
  0x18   :  { %24 = dma.hbm_to_vmem [thread:$0]  %s617_s0, 128, %s22_s9, [#allocation3]  }
  0x19   :  { %s467_s15 = scalar_lea.vmem %s49_s11, 2048  ;;  %p472_p11 = scmp.lt.s32.totalorder %s49_s11, %s49_s11 }
  0x1a   :  { %p468_p10 = scmp.ne.s32.totalorder %s49_s11, %s467_s15  ;;  %p473_p12 = scmp.lt.s32.totalorder %s467_s15, %s467_s15 }
  0x1c   :  { %p474_p13 = por %p473_p12, %p472_p11 }
  0x1e   :  { %p475_p0 = pnand %p474_p13, %p468_p10 }
  0x20   :  { %478 = shalt.err (!%p475_p0)
}
  0x21   :  { %54 = dma.hbm_to_vmem [thread:$0]  %s622_s5, 2048, %s49_s11, [#allocation6], %s506_s27, %s506_s27, %s507_s28  }
  0x22   :  { %499 = dma.done.wait [#allocation3], 128  }
  0x23   :  { %500 = vsyncadd [#allocation3], 4294967168 }
  0x24   :  { %501 = dma.done.wait [#allocation6], 4096  }
  0x25   :  { %502 = vsyncadd [#allocation6], 4294963200  ;;  %v510_v0 = vmov 0.0   ;;  %vm511_vm0 = vmmov 0   ;;  %v82_v1 = vld [vmem:[#allocation5 + $0x78] sm:$0xff]  ;;  %v81_v2 = vld [vmem:[#allocation5 + $0x70] sm:$0xff] }
  0x26   :  { %339 = vmatprep.subr.mxu0 %v510_v0  ;;  %371 = vmatprep.mubr.msk.f32.mxu0 %vm511_vm0, %v510_v0  ;;  %v80_v3 = vld [vmem:[#allocation5 + $0x68] sm:$0xff]  ;;  %v79_v4 = vld [vmem:[#allocation5 + $0x60] sm:$0xff]  ;;  %v78_v5 = vld [vmem:[#allocation5 + $0x58] sm:$0xff]  ;;  %s512_s22 = smov [#allocation8]  }
  0x27   :  { %374 = vmatprep.subr.mxu1 %v510_v0  ;;  %406 = vmatprep.mubr.msk.f32.mxu1 %vm511_vm0, %v510_v0  ;;  %v77_v6 = vld [vmem:[#allocation5 + $0x50] sm:$0xff]  ;;  %v76_v7 = vld [vmem:[#allocation5 + $0x48] sm:$0xff]  ;;  %v75_v8 = vld [vmem:[#allocation5 + $0x40] sm:$0xff]  ;;  %s291_s23 = sshll.u32 %s512_s22, 4  ;;  %s292_s23 = int_to_ptr.vmem [resolvable:$true] %s291_s23 }
  0x28   :  { %340 = vmatpush3.msra.mxu0 %v82_v1  ;;  %v74_v9 = vld [vmem:[#allocation5 + $0x38] sm:$0xff]  ;;  %v73_v10 = vld [vmem:[#allocation5 + $0x30] sm:$0xff]  ;;  %v72_v11 = vld [vmem:[#allocation5 + $0x28] sm:$0xff]  ;;  %p484_p2 = scmp.lt.s32.totalorder %s292_s23, %s292_s23 }
  0x29   :  { %341 = vmatprep.subr.mxu0 %v510_v0  ;;  %v71_v12 = vld [vmem:[#allocation5 + $0x20] sm:$0xff]  ;;  %v70_v13 = vld [vmem:[#allocation5 + $0x18] sm:$0xff]  ;;  %v69_v14 = vld [vmem:[#allocation5 + $0x10] sm:$0xff] }
  0x2a   :  { %342 = vmatpush3.msra.mxu0 %v81_v2  ;;  %v68_v15 = vld [vmem:[#allocation5 + $0x8] sm:$0xff]  ;;  %v67_v16 = vld [vmem:[#allocation5] sm:$0xff]  ;;  %v66_v17 = vld [vmem:[#allocation2] sm:$0xff] }
  0x2b   :  { %343 = vmatprep.subr.mxu0 %v510_v0  ;;  %v301_v18 = vld [vmem:[%s619_s2] ss:$0 sm:$0xff]  ;;  %v205_v24 = vld [vmem:[#allocation7 + $0x70] sm:$0xff]  ;;  %v204_v25 = vld [vmem:[#allocation7 + $0x68] sm:$0xff] }
  0x2c   :  { %344 = vmatpush3.msra.mxu0 %v80_v3  ;;  %v206_v23 = vld [vmem:[#allocation7 + $0x78] sm:$0xff]  ;;  %v203_v26 = vld [vmem:[#allocation7 + $0x60] sm:$0xff]  ;;  %v201_v28 = vld [vmem:[#allocation7 + $0x50] sm:$0xff] }
  0x2d   :  { %345 = vmatprep.subr.mxu0 %v510_v0  ;;  %375 = vmatpush3.msra.mxu1 %v206_v23  ;;  %v202_v27 = vld [vmem:[#allocation7 + $0x58] sm:$0xff]  ;;  %v200_v29 = vld [vmem:[#allocation7 + $0x48] sm:$0xff]  ;;  %v199_v30 = vld [vmem:[#allocation7 + $0x40] sm:$0xff] }
  0x2e   :  { %346 = vmatpush3.msra.mxu0 %v79_v4  ;;  %376 = vmatprep.subr.mxu1 %v510_v0  ;;  %v198_v31 = vld [vmem:[#allocation7 + $0x38] sm:$0xff]  ;;  %v197_v32 = vld [vmem:[#allocation7 + $0x30] sm:$0xff]  ;;  %v196_v33 = vld [vmem:[#allocation7 + $0x28] sm:$0xff] }
  0x2f   :  { %347 = vmatprep.subr.mxu0 %v510_v0  ;;  %377 = vmatpush3.msra.mxu1 %v205_v24  ;;  %v195_v34 = vld [vmem:[#allocation7 + $0x20] sm:$0xff]  ;;  %v194_v35 = vld [vmem:[#allocation7 + $0x18] sm:$0xff]  ;;  %v193_v36 = vld [vmem:[#allocation7 + $0x10] sm:$0xff] }
  0x30   :  { %348 = vmatpush3.msra.mxu0 %v78_v5  ;;  %378 = vmatprep.subr.mxu1 %v510_v0  ;;  %v192_v37 = vld [vmem:[#allocation7 + $0x8] sm:$0xff]  ;;  %v191_v38 = vld [vmem:[#allocation7] sm:$0xff]  ;;  %v302_v47 = vld [vmem:[%s620_s3] ss:$0 sm:$0xff]  ;;  %s479_s3 = scalar_lea.vmem %s292_s23, 128 }
  0x31   :  { %349 = vmatprep.subr.mxu0 %v510_v0  ;;  %379 = vmatpush3.msra.mxu1 %v204_v25  ;;  %v303_v51 = vld [vmem:[%s621_s4] ss:$0 sm:$0xff]  ;;  %p480_p1 = scmp.ne.s32.totalorder %s292_s23, %s479_s3  ;;  %p485_p3 = scmp.lt.s32.totalorder %s479_s3, %s479_s3 }
  0x32   :  { %350 = vmatpush3.msra.mxu0 %v77_v6  ;;  %380 = vmatprep.subr.mxu1 %v510_v0  ;;  %v304_v55 = vld [vmem:[%s623_s6] ss:$0 sm:$0xff] }
  0x33   :  { %351 = vmatprep.subr.mxu0 %v510_v0  ;;  %381 = vmatpush3.msra.mxu1 %v203_v26  ;;  %p486_p4 = por %p485_p3, %p484_p2 }
  0x34   :  { %352 = vmatpush3.msra.mxu0 %v76_v7  ;;  %382 = vmatprep.subr.mxu1 %v510_v0 }
  0x35   :  { %353 = vmatprep.subr.mxu0 %v510_v0  ;;  %383 = vmatpush3.msra.mxu1 %v202_v27  ;;  %p487_p5 = pnand %p486_p4, %p480_p1 }
  0x36   :  { %354 = vmatpush3.msra.mxu0 %v75_v8  ;;  %384 = vmatprep.subr.mxu1 %v510_v0 }
  0x37   :  { %355 = vmatprep.subr.mxu0 %v510_v0  ;;  %385 = vmatpush3.msra.mxu1 %v201_v28 }
  0x38   :  { %356 = vmatpush3.msra.mxu0 %v74_v9  ;;  %386 = vmatprep.subr.mxu1 %v510_v0 }
  0x39   :  { %357 = vmatprep.subr.mxu0 %v510_v0  ;;  %387 = vmatpush3.msra.mxu1 %v200_v29 }
  0x3a   :  { %358 = vmatpush3.msra.mxu0 %v73_v10  ;;  %388 = vmatprep.subr.mxu1 %v510_v0 }
  0x3b   :  { %359 = vmatprep.subr.mxu0 %v510_v0  ;;  %389 = vmatpush3.msra.mxu1 %v199_v30 }
  0x3c   :  { %360 = vmatpush3.msra.mxu0 %v72_v11  ;;  %390 = vmatprep.subr.mxu1 %v510_v0 }
  0x3d   :  { %361 = vmatprep.subr.mxu0 %v510_v0  ;;  %391 = vmatpush3.msra.mxu1 %v198_v31 }
  0x3e   :  { %362 = vmatpush3.msra.mxu0 %v71_v12  ;;  %392 = vmatprep.subr.mxu1 %v510_v0 }
  0x3f   :  { %363 = vmatprep.subr.mxu0 %v510_v0  ;;  %393 = vmatpush3.msra.mxu1 %v197_v32 }
  0x40   :  { %364 = vmatpush3.msra.mxu0 %v70_v13  ;;  %394 = vmatprep.subr.mxu1 %v510_v0 }
  0x41   :  { %365 = vmatprep.subr.mxu0 %v510_v0  ;;  %395 = vmatpush3.msra.mxu1 %v196_v33 }
  0x42   :  { %366 = vmatpush3.msra.mxu0 %v69_v14  ;;  %396 = vmatprep.subr.mxu1 %v510_v0 }
  0x43   :  { %367 = vmatprep.subr.mxu0 %v510_v0  ;;  %397 = vmatpush3.msra.mxu1 %v195_v34 }
  0x44   :  { %368 = vmatpush3.msra.mxu0 %v68_v15  ;;  %398 = vmatprep.subr.mxu1 %v510_v0 }
  0x45   :  { %369 = vmatprep.subr.mxu0 %v510_v0  ;;  %399 = vmatpush3.msra.mxu1 %v194_v35 }
  0x46   :  { %370 = vmatpush3.msra.mxu0 %v67_v16  ;;  %400 = vmatprep.subr.mxu1 %v510_v0 }
  0x47   :  { %372 = vmatmul.mubr.f32.vlgmr.msra.gmra.mxu0 %v66_v17  ;;  %401 = vmatpush3.msra.mxu1 %v193_v36 }
  0x48   :  { %402 = vmatprep.subr.mxu1 %v510_v0 }
  0x49   :  { %403 = vmatpush3.msra.mxu1 %v192_v37 }
  0x4a   :  { %404 = vmatprep.subr.mxu1 %v510_v0 }
  0x4b   :  { %405 = vmatpush3.msra.mxu1 %v191_v38 }
 0x107   :  { %v156_v19 = vpop.f32.mrf.mxu0 }
 0x108   :  { %v584_v20 = vadd.f32 %v301_v18, %v156_v19 }
 0x109   :  { %v373_v21 = vpop.f32.mrf.mxu0 }
 0x10a   :  { %160 = vadd.xlane.f32.xlu0 %v584_v20  ;;  %v162_v22 = vmul.f32 %v584_v20, %v584_v20 }
 0x10e   :  { %163 = vadd.xlane.f32.xlu0 %v162_v22 }
 0x193   :  { %v161_v39 = vpop.xlane.xlu0 %160 }
 0x194   :  { %v165_v40 = vmul.f32 0.03125, %v161_v39 }
 0x196   :  { %v167_v42 = vmul.f32 %v165_v40, %v165_v40  ;;  %v172_v49 = vsub.f32 %v584_v20, %v165_v40 }
 0x197   :  { %v164_v41 = vpop.xlane.xlu0 %163 }
 0x198   :  { %v166_v43 = vmul.f32 0.03125, %v164_v41 }
 0x19a   :  { %v168_v44 = vsub.f32 %v166_v43, %v167_v42 }
 0x19c   :  { %v169_v45 = vmax.f32 %v168_v44, 0.0 }
 0x19e   :  { %v170_v46 = vadd.f32 1e-05, %v169_v45 }
 0x1a0   :  { %417 = vrsqrt.f32 %v170_v46 }
 0x1ad   :  { %v418_v48 = vpop.eup %417 }
 0x1ae   :  { %v180_v50 = vmul.f32 %v418_v48, %v302_v47 }
 0x1b0   :  { %v181_v52 = vmul.f32 %v180_v50, %v172_v49 }
 0x1b2   :  { %v189_v53 = vadd.f32 %v303_v51, %v181_v52 }
 0x1b4   :  { %v190_v54 = vmax.f32 %v189_v53, 0.0 }
 0x1b6   :  { %407 = vmatmul.mubr.f32.vlgmr.msra.gmra.mxu1 %v190_v54 }
 0x276   :  { %v280_v56 = vpop.f32.mrf.mxu1 }
 0x277   :  { %v281_v57 = vadd.f32 %v304_v55, %v280_v56 }
 0x278   :  { %v408_v58 = vpop.f32.mrf.mxu1 }
 0x279   :  { %284 = vst [vmem:[#allocation8] sm:$0xff] %v281_v57 }
 0x27a   :  { %490 = shalt.err (!%p487_p5)
}
 0x27b   :  { %294 = dma.vmem_to_hbm [thread:$0]  %s292_s23, 128, %s624_s7, [#allocation4]  }
 0x27c   :  { %503 = dma.done.wait [#allocation4], 128  }
 0x27d   :  { %504 = vsyncadd [#allocation4], 4294967168 }
 0x27e   :  { %298 = vsyncpa [#allocation3], 1 }
 0x27f   :  { %299 = vsyncpa [#allocation6], 1 }
 0x280   :  { %300 = vsyncpa [#allocation4], 1 }

</bundles_post_ra>
